<compile_context>
chip_gen: v7x
topology: tpu7x:2x2x1
jax: 0.10.0
libtpu: 0.0.40
codegen_flags: <defaults>
</compile_context>

<pallas_src>
import functools

import jax
import jax.numpy as jnp
from jax.experimental import pallas as pl
from jax.experimental.pallas import tpu as pltpu

_LANE = 128
_K_PAD = 8  # fc1 in_features (4) zero-padded to 8 for the MXU pass


def _round_up(v, m):
    return ((v + m - 1) // m) * m


def _tpu_generation():
    try:
        kind = jax.devices()[0].device_kind.lower()
    except Exception:
        return None
    for gen in ("v7", "v6", "v5", "v4", "v3", "v2"):
        if gen in kind:
            return gen
    return None


def _select_compute_dtype(gen=None):
    gen = _tpu_generation() if gen is None else gen
    # bf16 VALU exists on v6e/v7x (halves epilogue VPU work); keep f32
    # epilogues on v5e / older / unknown chips.
    return jnp.bfloat16 if gen in ("v6", "v7") else jnp.float32


def dqn_kernel(x_ref, w1_ref, b1_ref, w2_ref, b2_ref, w3_ref, b3_ref, o_ref, *,
               compute_dtype):
    # fc1 on the MXU: (128, 8) @ (8, tile_b), K zero-padded 4 -> 8, f32 acc.
    h1 = jnp.dot(w1_ref[...], x_ref[...], preferred_element_type=jnp.float32)
    h1 = jnp.maximum(h1.astype(compute_dtype) + b1_ref[...], 0).astype(jnp.bfloat16)

    # fc2 on the MXU: weight-stationary (128, 128) @ (128, tile_b), f32 acc.
    h2 = jnp.dot(w2_ref[...], h1, preferred_element_type=jnp.float32)
    h2 = jnp.maximum(h2.astype(compute_dtype) + b2_ref[...], 0).astype(jnp.bfloat16)

    # fc3 as a 1-row MXU pass -> lane-dense (1, tile_b) output row.
    out = jnp.dot(w3_ref[...], h2, preferred_element_type=jnp.float32) + b3_ref[0]
    o_ref[...] = out.astype(o_ref.dtype)


def deep_q_network(x, w1, b1, w2, b2, w3, b3, *, tile_b=4096):
    """Forward pass of the Tetris DeepQNetwork.

    x:  (B, 4) float32 state features.
    w1: (128, 4),  b1: (128,)   -- nn.Linear(4, 128)  (PyTorch layout)
    w2: (128, 128), b2: (128,)  -- nn.Linear(128, 128)
    w3: (1, 128),  b3: (1,)     -- nn.Linear(128, 1)
    Returns (B, 1) float32: fc3(relu(fc2(relu(fc1(x))))).
    """
    B = x.shape[0]
    gen = _tpu_generation()
    compute_dtype = _select_compute_dtype(gen)

    # Batch tile: lane-aligned (multiple of 128), no larger than needed.
    tile_b = max(_LANE, (int(tile_b) // _LANE) * _LANE)
    tile_b = min(tile_b, _round_up(B, _LANE))
    padded_b = _round_up(B, tile_b)
    # v7x has 2 TensorCores: split a single-tile grid so both cores get work.
    if gen == "v7" and padded_b == tile_b and tile_b % (2 * _LANE) == 0:
        tile_b //= 2
    num_tiles = padded_b // tile_b

    # Host-side layout prep (tiny): transpose x to (K, B), pad K 4->8 and B up
    # to padded_b; cast MXU operands to bf16, biases to the epilogue dtype.
    xt = jnp.pad(x.T.astype(jnp.bfloat16),
                 ((0, _K_PAD - x.shape[1]), (0, padded_b - B)))       # (8, padded_b)
    w1p = jnp.pad(w1.astype(jnp.bfloat16),
                  ((0, 0), (0, _K_PAD - w1.shape[1])))                # (128, 8)
    w2b = w2.astype(jnp.bfloat16)                                     # (128, 128)
    w3b = w3.astype(jnp.bfloat16)                                     # (1, 128)
    b1c = b1.reshape(-1, 1).astype(compute_dtype)                     # (128, 1)
    b2c = b2.reshape(-1, 1).astype(compute_dtype)                     # (128, 1)
    b3s = b3.reshape(-1).astype(jnp.float32)                          # (1,) -> SMEM

    const = lambda shape: pl.BlockSpec(shape, lambda i: (0, 0))
    flops = int(2 * padded_b * (_K_PAD * 128 + 128 * 128 + 128))
    bytes_accessed = int(padded_b * (_K_PAD * 2 + 4)
                         + 2 * (w1p.size + w2b.size + w3b.size)
                         + 4 * (b1c.size + b2c.size + b3s.size))

    out = pl.pallas_call(
        functools.partial(dqn_kernel, compute_dtype=compute_dtype),
        out_shape=jax.ShapeDtypeStruct((1, padded_b), jnp.float32),
        grid=(num_tiles,),
        in_specs=[
            pl.BlockSpec((_K_PAD, tile_b), lambda i: (0, i)),    # x, lane-tiled batch
            const(w1p.shape),                                    # (128, 8)
            const(b1c.shape),                                    # (128, 1)
            const(w2b.shape),                                    # (128, 128)
            const(b2c.shape),                                    # (128, 1)
            const(w3b.shape),                                    # (1, 128)
            pl.BlockSpec(memory_space=pltpu.MemorySpace.SMEM),   # b3 scalar
        ],
        out_specs=pl.BlockSpec((1, tile_b), lambda i: (0, i)),   # lane-dense row
        compiler_params=pltpu.CompilerParams(
            dimension_semantics=("parallel",),
            # Default tile (<=4096) needs only a few MiB of VMEM on any chip;
            # only bump the scoped limit for very large caller-requested tiles.
            vmem_limit_bytes=(64 * 1024 * 1024 if tile_b > 6144 else None),
        ),
        cost_estimate=pl.CostEstimate(
            flops=flops, transcendentals=0, bytes_accessed=bytes_accessed),
    )(xt, w1p, b1c, w2b, b2c, w3b, b3s)

    return out[0, :B].reshape(B, 1)


def xavier_uniform(key, shape):
    # Matches torch.nn.init.xavier_uniform_ for nn.Linear weights (out, in).
    fan_out, fan_in = shape
    bound = (6.0 / (fan_in + fan_out)) ** 0.5
    return jax.random.uniform(key, shape, dtype=jnp.float32,
                              minval=-bound, maxval=bound)


def init_params(key):
    k1, k2, k3 = jax.random.split(key, 3)
    w1 = xavier_uniform(k1, (128, 4))
    b1 = jnp.zeros((128,), jnp.float32)
    w2 = xavier_uniform(k2, (128, 128))
    b2 = jnp.zeros((128,), jnp.float32)
    w3 = xavier_uniform(k3, (1, 128))
    b3 = jnp.zeros((1,), jnp.float32)
    return w1, b1, w2, b2, w3, b3


def reference_forward(x, w1, b1, w2, b2, w3, b3, *, mirror_kernel=False,
                      compute_dtype=jnp.float32):
    if not mirror_kernel:
        # Pure-f32 PyTorch-equivalent forward.
        h1 = jnp.maximum(x @ w1.T + b1, 0.0)
        h2 = jnp.maximum(h1 @ w2.T + b2, 0.0)
        return h2 @ w3.T + b3
    # Mirrors the kernel's bf16-operand / f32-accumulate matmuls and epilogues.
    bf = jnp.bfloat16
    h1 = jnp.dot(x.astype(bf), w1.astype(bf).T, preferred_element_type=jnp.float32)
    h1 = jnp.maximum(h1.astype(compute_dtype) + b1.astype(compute_dtype), 0).astype(bf)
    h2 = jnp.dot(h1, w2.astype(bf).T, preferred_element_type=jnp.float32)
    h2 = jnp.maximum(h2.astype(compute_dtype) + b2.astype(compute_dtype), 0).astype(bf)
    return jnp.dot(h2, w3.astype(bf).T, preferred_element_type=jnp.float32) + b3


if __name__ == "__main__":
    key = jax.random.PRNGKey(0)
    pkey, xkey = jax.random.split(key)
    params = init_params(pkey)

    # Tetris DQN takes a batch of 4-dim state features: (B, 4)
    B = 8
    x = jax.random.normal(xkey, (B, 4), dtype=jnp.float32)

    out = jax.block_until_ready(deep_q_network(x, *params))
    assert out.shape == (B, 1)

    # Tight check against a reference mirroring the kernel's bf16 dtypes.
    cdt = _select_compute_dtype()
    ref_bf16 = reference_forward(x, *params, mirror_kernel=True, compute_dtype=cdt)
    assert jnp.allclose(out, ref_bf16, atol=5e-3, rtol=5e-3), (out, ref_bf16)

    # Loose check against the pure-f32 PyTorch-equivalent forward (kernel uses
    # bf16 MXU operands by design).
    ref_f32 = reference_forward(x, *params)
    assert jnp.allclose(out, ref_f32, atol=5e-2, rtol=5e-2), (out, ref_f32)

    print("KERNEL_OK")
</pallas_src>

<mosaic_0001>
module attributes {stable_mosaic.version = 11 : i64} {
  func.func @dqn_kernel(%arg0: i32, %arg1: memref<8x128xbf16, #tpu.memory_space<vmem>>, %arg2: memref<128x8xbf16, #tpu.memory_space<vmem>>, %arg3: memref<128x1xf32, #tpu.memory_space<vmem>>, %arg4: memref<128x128xbf16, #tpu.memory_space<vmem>>, %arg5: memref<128x1xf32, #tpu.memory_space<vmem>>, %arg6: memref<1x128xbf16, #tpu.memory_space<vmem>>, %arg7: memref<1xf32, #tpu.memory_space<smem>>, %arg8: memref<1x128xf32, #tpu.memory_space<vmem>>) attributes {dimension_semantics = [#tpu.dimension_semantics<parallel>], iteration_bounds = array<i64: 1>, scalar_prefetch = 0 : i64, scratch_operands = 0 : i64, tpu.core_type = #tpu.core_type<tc>, window_params = [{transform_indices = @transform_0, window_bounds = array<i64: 8, 128>}, {pipeline_mode = #tpu.pipeline_mode<synchronous>, transform_indices = @transform_1, window_bounds = array<i64: 128, 8>}, {pipeline_mode = #tpu.pipeline_mode<synchronous>, transform_indices = @transform_2, window_bounds = array<i64: 128, 1>}, {pipeline_mode = #tpu.pipeline_mode<synchronous>, transform_indices = @transform_3, window_bounds = array<i64: 128, 128>}, {pipeline_mode = #tpu.pipeline_mode<synchronous>, transform_indices = @transform_4, window_bounds = array<i64: 128, 1>}, {pipeline_mode = #tpu.pipeline_mode<synchronous>, transform_indices = @transform_5, window_bounds = array<i64: 1, 128>}, {transform_indices = @transform_6, window_bounds = array<i64: 1>}, {transform_indices = @transform_7, window_bounds = array<i64: 1, 128>}]} {
    %c0 = arith.constant 0 : index
    %c0_0 = arith.constant 0 : index
    %0 = vector.load %arg2[%c0, %c0_0] : memref<128x8xbf16, #tpu.memory_space<vmem>>, vector<128x8xbf16>
    %c0_1 = arith.constant 0 : index
    %c0_2 = arith.constant 0 : index
    %1 = vector.load %arg1[%c0_1, %c0_2] : memref<8x128xbf16, #tpu.memory_space<vmem>>, vector<8x128xbf16>
    %cst = arith.constant dense<0.000000e+00> : vector<128x128xf32>
    %2 = tpu.matmul %0, %1, %cst {dimension_numbers = #tpu.dot_dimension_numbers<[1], [0], [0], [1], [0, 0, 1, 1], [], []>} : vector<128x8xbf16>, vector<8x128xbf16>, vector<128x128xf32> -> vector<128x128xf32>
    %c0_3 = arith.constant 0 : index
    %c0_4 = arith.constant 0 : index
    %3 = vector.load %arg3[%c0_3, %c0_4] : memref<128x1xf32, #tpu.memory_space<vmem>>, vector<128x1xf32>
    %4 = vector.broadcast %3 : vector<128x1xf32> to vector<128x128xf32>
    %5 = arith.addf %2, %4 : vector<128x128xf32>
    %cst_5 = arith.constant 0.000000e+00 : f32
    %6 = vector.broadcast %cst_5 : f32 to vector<128x128xf32>
    %7 = arith.maximumf %5, %6 : vector<128x128xf32>
    %8 = arith.truncf %7 : vector<128x128xf32> to vector<128x128xbf16>
    %c0_6 = arith.constant 0 : index
    %c0_7 = arith.constant 0 : index
    %9 = vector.load %arg4[%c0_6, %c0_7] : memref<128x128xbf16, #tpu.memory_space<vmem>>, vector<128x128xbf16>
    %cst_8 = arith.constant dense<0.000000e+00> : vector<128x128xf32>
    %10 = tpu.matmul %9, %8, %cst_8 {dimension_numbers = #tpu.dot_dimension_numbers<[1], [0], [0], [1], [0, 0, 1, 1], [], []>} : vector<128x128xbf16>, vector<128x128xbf16>, vector<128x128xf32> -> vector<128x128xf32>
    %c0_9 = arith.constant 0 : index
    %c0_10 = arith.constant 0 : index
    %11 = vector.load %arg5[%c0_9, %c0_10] : memref<128x1xf32, #tpu.memory_space<vmem>>, vector<128x1xf32>
    %12 = vector.broadcast %11 : vector<128x1xf32> to vector<128x128xf32>
    %13 = arith.addf %10, %12 : vector<128x128xf32>
    %cst_11 = arith.constant 0.000000e+00 : f32
    %14 = vector.broadcast %cst_11 : f32 to vector<128x128xf32>
    %15 = arith.maximumf %13, %14 : vector<128x128xf32>
    %16 = arith.truncf %15 : vector<128x128xf32> to vector<128x128xbf16>
    %c0_12 = arith.constant 0 : index
    %c0_13 = arith.constant 0 : index
    %17 = vector.load %arg6[%c0_12, %c0_13] : memref<1x128xbf16, #tpu.memory_space<vmem>>, vector<1x128xbf16>
    %cst_14 = arith.constant dense<0.000000e+00> : vector<1x128xf32>
    %18 = tpu.matmul %17, %16, %cst_14 {dimension_numbers = #tpu.dot_dimension_numbers<[1], [0], [0], [1], [0, 0, 1, 1], [], []>} : vector<1x128xbf16>, vector<128x128xbf16>, vector<1x128xf32> -> vector<1x128xf32>
    %c0_15 = arith.constant 0 : index
    %19 = memref.load %arg7[%c0_15] : memref<1xf32, #tpu.memory_space<smem>>
    %20 = vector.broadcast %19 : f32 to vector<1x128xf32>
    %21 = arith.addf %18, %20 : vector<1x128xf32>
    %c0_16 = arith.constant 0 : index
    %c0_17 = arith.constant 0 : index
    %22 = vector.load %arg8[%c0_16, %c0_17] : memref<1x128xf32, #tpu.memory_space<vmem>>, vector<1x128xf32>
    tpu.vector_store %arg8[%c0_16, %c0_17], %21 {strides = array<i32>} : memref<1x128xf32, #tpu.memory_space<vmem>>, vector<1x128xf32>,
    return
  }
  func.func @transform_0(%arg0: i32) -> (i32, i32) {
    %c0_i32 = arith.constant 0 : i32
    %c0_i32_0 = arith.constant 0 : i32
    return %c0_i32, %arg0 : i32, i32
  }
  func.func @transform_1(%arg0: i32) -> (i32, i32) {
    %c0_i32 = arith.constant 0 : i32
    %c0_i32_0 = arith.constant 0 : i32
    %c0_i32_1 = arith.constant 0 : i32
    return %c0_i32, %c0_i32_0 : i32, i32
  }
  func.func @transform_2(%arg0: i32) -> (i32, i32) {
    %c0_i32 = arith.constant 0 : i32
    %c0_i32_0 = arith.constant 0 : i32
    %c0_i32_1 = arith.constant 0 : i32
    return %c0_i32, %c0_i32_0 : i32, i32
  }
  func.func @transform_3(%arg0: i32) -> (i32, i32) {
    %c0_i32 = arith.constant 0 : i32
    %c0_i32_0 = arith.constant 0 : i32
    %c0_i32_1 = arith.constant 0 : i32
    return %c0_i32, %c0_i32_0 : i32, i32
  }
  func.func @transform_4(%arg0: i32) -> (i32, i32) {
    %c0_i32 = arith.constant 0 : i32
    %c0_i32_0 = arith.constant 0 : i32
    %c0_i32_1 = arith.constant 0 : i32
    return %c0_i32, %c0_i32_0 : i32, i32
  }
  func.func @transform_5(%arg0: i32) -> (i32, i32) {
    %c0_i32 = arith.constant 0 : i32
    %c0_i32_0 = arith.constant 0 : i32
    %c0_i32_1 = arith.constant 0 : i32
    return %c0_i32, %c0_i32_0 : i32, i32
  }
  func.func @transform_6(%arg0: i32) -> i32 {
    %c0_i32 = arith.constant 0 : i32
    %c0_i32_0 = arith.constant 0 : i32
    return %c0_i32 : i32
  }
  func.func @transform_7(%arg0: i32) -> (i32, i32) {
    %c0_i32 = arith.constant 0 : i32
    %c0_i32_0 = arith.constant 0 : i32
    return %c0_i32, %arg0 : i32, i32
  }
}

</mosaic_0001>

<bundles_post_ra>
// kernel: tpu_custom_call.1
= control target key start
LH: loop header
LB: loop body
LE: loop exit
PB: predicated region body
PF: predicated region fallthrough
CT: control target
= control target key end

     0   :  { %vm207_vm0 = vcmask 1043456   ;;  %vm182_vm1 = vcmask 64512   ;;  %v846_v5 = vmov 0   ;;  %s1072_s0 = inlined_call_operand.vmem [shape: bf16[8,128], index: 0, kind: input, shape index: {}]   ;;  %s1073_s1 = inlined_call_operand.vmem [shape: bf16[128,8], index: 1, kind: input, shape index: {}]   ;;  %s1074_s2 = inlined_call_operand.vmem [shape: f32[128,1], index: 2, kind: input, shape index: {}]   ;;  %s1075_s3 = inlined_call_operand.vmem [shape: bf16[128,128], index: 3, kind: input, shape index: {}]   ;;  %s1076_s4 = inlined_call_operand.vmem [shape: f32[128,1], index: 4, kind: input, shape index: {}]   ;;  %s1077_s5 = inlined_call_operand.vmem [shape: bf16[1,128], index: 5, kind: input, shape index: {}]   ;;  %s1078_s6 = inlined_call_operand.<no memory space> [shape: f32[1], index: 6, kind: input, shape index: {}]   ;;  %s1079_s7 = inlined_call_operand.hbm [shape: f32[1,128], index: 7, kind: output, shape index: {}]  }
   0x1   :  { %v45_v0 = vld [vmem:[%s1072_s0] sm:$0xf]  ;;  %v807_v3 = vld [vmem:[%s1073_s1 + $0x8] sm:$0xff]   ;;  %v808_v4 = vld [vmem:[%s1073_s1 + $0x10] sm:$0xff]   ;;  %804 = vset.pattern.permute.xlu0 %v846_v5  ;;  %805 = vset.pattern.permute.xlu1 %v846_v5 }
   0x2   :  { %v806_v1 = vld [vmem:[%s1073_s1] sm:$0xff]   ;;  %799 = vmatprep.subr.msk.bf16.mxu0 %vm207_vm0, %v45_v0  ;;  %v209_v2 = vsel %vm207_vm0, %v45_v0, 0  ;;  %v809_v7 = vld [vmem:[%s1073_s1 + $0x18] sm:$0xff]   ;;  %v48_v8 = vld [vmem:[%s1074_s2 + $0x10] sm:$0xff] }
   0x3   :  { %730 = vmatpush3.bf16.msra.mxu0 %v209_v2  ;;  %731 = vmatprep.mubr.msk.bf16.mxu0 %vm182_vm1, %v806_v1  ;;  %v46_v6 = vld [vmem:[%s1074_s2] sm:$0xff]  ;;  %v47_v9 = vld [vmem:[%s1074_s2 + $0x8] sm:$0xff]  ;;  %v49_v11 = vld [vmem:[%s1074_s2 + $0x18] sm:$0xff] }
   0x4   :  { %64 = vperm.xlu0 %804, %v46_v6   ;;  %v810_v10 = vld [vmem:[%s1073_s1 + $0x20] sm:$0xff]   ;;  %74 = vperm.xlu1 %805, %v48_v8   ;;  %v51_v13 = vld [vmem:[%s1074_s2 + $0x28] sm:$0xff]  ;;  %v52_v14 = vld [vmem:[%s1074_s2 + $0x30] sm:$0xff] }
   0x5   :  { %v50_v12 = vld [vmem:[%s1074_s2 + $0x20] sm:$0xff]  ;;  %v811_v15 = vld [vmem:[%s1073_s1 + $0x28] sm:$0xff]   ;;  %v812_v16 = vld [vmem:[%s1073_s1 + $0x30] sm:$0xff]  }
   0x6   :  { %732 = vmatmul.mubr.msk.bf16.vlgmr.msra.gmra.mrb[0].mxu0 %vm182_vm1, %v807_v3  ;;  %v53_v17 = vld [vmem:[%s1074_s2 + $0x38] sm:$0xff]  ;;  %v54_v18 = vld [vmem:[%s1074_s2 + $0x40] sm:$0xff]  ;;  %v55_v19 = vld [vmem:[%s1074_s2 + $0x48] sm:$0xff] }
   0x7   :  { %735 = vmatprep.mubr.msk.bf16.mxu0 %vm182_vm1, %v808_v4  ;;  %v56_v20 = vld [vmem:[%s1074_s2 + $0x50] sm:$0xff] }
   0x8   :  { %69 = vperm.xlu0 %804, %v47_v9   ;;  %79 = vperm.xlu1 %805, %v49_v11  }
   0xc   :  { %84 = vperm.xlu0 %804, %v50_v12   ;;  %89 = vperm.xlu1 %805, %v51_v13  }
   0xe   :  { %736 = vmatmul.mubr.msk.bf16.gmra.mrb[4].mxu0 %vm182_vm1, %v809_v7 }
   0xf   :  { %739 = vmatprep.mubr.msk.bf16.mxu0 %vm182_vm1, %v810_v10 }
  0x10   :  { %94 = vperm.xlu0 %804, %v52_v14   ;;  %99 = vperm.xlu1 %805, %v53_v17  }
  0x14   :  { %104 = vperm.xlu0 %804, %v54_v18  }
  0x16   :  { %740 = vmatmul.mubr.msk.bf16.gmra.mrb[8].mxu0 %vm182_vm1, %v811_v15 }
  0x17   :  { %743 = vmatprep.mubr.msk.bf16.mxu0 %vm182_vm1, %v812_v16 }
  0x18   :  { %13 = vsyncpa [#allocation4], 0  ;;  %v813_v21 = vld [vmem:[%s1073_s1 + $0x38] sm:$0xff]   ;;  %109 = vperm.xlu1 %805, %v55_v19   ;;  %114 = vperm.xlu0 %804, %v56_v20   ;;  %v58_v23 = vld [vmem:[%s1074_s2 + $0x60] sm:$0xff]  ;;  %vm848_vm2 = vmmov 0   ;;  %s849_s23 = smov [#allocation3]  }
  0x19   :  { %v57_v22 = vld [vmem:[%s1074_s2 + $0x58] sm:$0xff]  ;;  %v59_v24 = vld [vmem:[%s1074_s2 + $0x68] sm:$0xff]  ;;  %v60_v25 = vld [vmem:[%s1074_s2 + $0x70] sm:$0xff]  ;;  %s663_s24 = sshll.u32 %s849_s23, 4  ;;  %s664_s24 = int_to_ptr.vmem [resolvable:$true] %s663_s24 }
  0x1a   :  { %v61_v26 = vld [vmem:[%s1074_s2 + $0x78] sm:$0xff]  ;;  %v348_v27 = vld [vmem:[%s1076_s4] sm:$0xff]  ;;  %v349_v28 = vld [vmem:[%s1076_s4 + $0x8] sm:$0xff]  ;;  %s822_s25 = scalar_lea.vmem %s664_s24, 16  ;;  %s826_s26 = scalar_lea.vmem %s664_s24, 32 }
  0x1b   :  { %v350_v29 = vld [vmem:[%s1076_s4 + $0x10] sm:$0xff]  ;;  %v351_v30 = vld [vmem:[%s1076_s4 + $0x18] sm:$0xff]  ;;  %v352_v31 = vld [vmem:[%s1076_s4 + $0x20] sm:$0xff]  ;;  %p823_p0 = scmp.ne.s32.totalorder %s664_s24, %s822_s25  ;;  %p827_p1 = scmp.lt.s32.totalorder %s664_s24, %s664_s24 }
  0x1c   :  { %119 = vperm.xlu1 %805, %v57_v22   ;;  %124 = vperm.xlu0 %804, %v58_v23   ;;  %v353_v32 = vld [vmem:[%s1076_s4 + $0x28] sm:$0xff]  ;;  %v354_v33 = vld [vmem:[%s1076_s4 + $0x30] sm:$0xff]  ;;  %v355_v34 = vld [vmem:[%s1076_s4 + $0x38] sm:$0xff]  ;;  %p828_p2 = scmp.lt.s32.totalorder %s826_s26, %s822_s25 }
  0x1d   :  { %v356_v35 = vld [vmem:[%s1076_s4 + $0x40] sm:$0xff]  ;;  %v357_v36 = vld [vmem:[%s1076_s4 + $0x48] sm:$0xff]  ;;  %v358_v37 = vld [vmem:[%s1076_s4 + $0x50] sm:$0xff] }
  0x1e   :  { %744 = vmatmul.mubr.msk.bf16.gmra.mrb[12].mxu0 %vm182_vm1, %v813_v21  ;;  %v359_v38 = vld [vmem:[%s1076_s4 + $0x58] sm:$0xff]  ;;  %v360_v39 = vld [vmem:[%s1076_s4 + $0x60] sm:$0xff]  ;;  %v361_v40 = vld [vmem:[%s1076_s4 + $0x68] sm:$0xff]  ;;  %p829_p3 = por %p828_p2, %p827_p1 }
  0x1f   :  { %v362_v41 = vld [vmem:[%s1076_s4 + $0x70] sm:$0xff]  ;;  %v363_v42 = vld [vmem:[%s1076_s4 + $0x78] sm:$0xff]  ;;  %v814_v43 = vld [vmem:[%s1075_s3] sm:$0xff]  }
  0x20   :  { %129 = vperm.xlu1 %805, %v59_v24   ;;  %134 = vperm.xlu0 %804, %v60_v25   ;;  %p830_p4 = pnand %p829_p3, %p823_p0 }
  0x21   :  { %763 = vmatprep.mubr.bf16.mxu1 %v814_v43 }
  0x24   :  { %139 = vperm.xlu1 %805, %v61_v26   ;;  %366 = vperm.xlu0 %804, %v348_v27  }
  0x28   :  { %371 = vperm.xlu1 %805, %v349_v28   ;;  %376 = vperm.xlu0 %804, %v350_v29  }
  0x2c   :  { %381 = vperm.xlu1 %805, %v351_v30   ;;  %386 = vperm.xlu0 %804, %v352_v31  }
  0x30   :  { %391 = vperm.xlu1 %805, %v353_v32   ;;  %396 = vperm.xlu0 %804, %v354_v33  }
  0x34   :  { %401 = vperm.xlu1 %805, %v355_v34   ;;  %406 = vperm.xlu0 %804, %v356_v35  }
  0x38   :  { %411 = vperm.xlu1 %805, %v357_v36   ;;  %416 = vperm.xlu0 %804, %v358_v37  }
  0x3c   :  { %421 = vperm.xlu1 %805, %v359_v38   ;;  %426 = vperm.xlu0 %804, %v360_v39  }
  0x40   :  { %431 = vperm.xlu1 %805, %v361_v40   ;;  %436 = vperm.xlu0 %804, %v362_v41  }
  0x44   :  { %441 = vperm.xlu1 %805, %v363_v42  }
  0x83   :  { %v65_v44 = vpop.permute.xlu0 %64  ;;  %v75_v45 = vpop.permute.xlu1 %74 }
  0x87   :  { %v70_v46 = vpop.permute.xlu0 %69  ;;  %v80_v47 = vpop.permute.xlu1 %79 }
  0x8b   :  { %v85_v48 = vpop.permute.xlu0 %84  ;;  %v90_v49 = vpop.permute.xlu1 %89 }
  0x8f   :  { %v95_v50 = vpop.permute.xlu0 %94  ;;  %v100_v54 = vpop.permute.xlu1 %99 }
  0x93   :  { %v105_v62 = vpop.permute.xlu0 %104 }
  0x97   :  { %v110_v2 = vpop.permute.xlu1 %109  ;;  %v115_v11 = vpop.permute.xlu0 %114 }
  0x9b   :  { %v120_v15 = vpop.permute.xlu1 %119  ;;  %v125_v23 = vpop.permute.xlu0 %124 }
  0x9f   :  { %v130_v28 = vpop.permute.xlu1 %129  ;;  %v135_v35 = vpop.permute.xlu0 %134 }
  0xa3   :  { %v140_v40 = vpop.permute.xlu1 %139 }
  0xd9   :  { %v733_v51 = vpop.f32.mrb[0].mxu0 }
  0xda   :  { %v254_v52 = vadd.f32 %v733_v51, %v75_v45  ;;  %v245_v53 = vpop.f32.mrb[1].mxu0 }
  0xdb   :  { %v246_v55 = vadd.f32 %v245_v53, %v65_v44  ;;  %v734_v56 = vpop.f32.mrb[2].mxu0  ;;  %v816_v53 = vld [vmem:[%s1075_s3 + $0x10] sm:$0xff]  }
  0xdc   :  { %v257_v57 = vadd.f32 %v734_v56, %v80_v47  ;;  %v248_v58 = vpop.f32.mrb[3].mxu0  ;;  %v310_v60 = vmax.f32 %v254_v52, 0.0  ;;  %v815_v52 = vld [vmem:[%s1075_s3 + $0x8] sm:$0xff]  }
  0xdd   :  { %v249_v59 = vadd.f32 %v248_v58, %v70_v46  ;;  %v308_v63 = vmax.f32 %v246_v55, 0.0  ;;  %v818_v55 = vld [vmem:[%s1075_s3 + $0x20] sm:$0xff]   ;;  %v819_v56 = vld [vmem:[%s1075_s3 + $0x28] sm:$0xff]   ;;  %v821_v58 = vld [vmem:[%s1075_s3 + $0x38] sm:$0xff]  }
  0xde   :  { %v311_v61 = vmax.f32 %v257_v57, 0.0  ;;  %v820_v57 = vld [vmem:[%s1075_s3 + $0x30] sm:$0xff]  }
  0xdf   :  { %v309_v0 = vmax.f32 %v249_v59, 0.0  ;;  %v847_v59 = vmov 0.0  }
  0xe0   :  { %v325_v1 = vpack.c.bf16 %v311_v61, %v310_v60  ;;  %779 = vmatprep.subr.bf16.mxu0 %v847_v59  ;;  %795 = vmatprep.mubr.msk.bf16.mxu0 %vm848_vm2, %v847_v59  ;;  %v367_v60 = vpop.permute.xlu0 %366  ;;  %v372_v61 = vpop.permute.xlu1 %371 }
  0xe1   :  { %v737_v3 = vpop.f32.mrb[4].mxu0  ;;  %v324_v4 = vpack.c.bf16 %v309_v0, %v308_v63 }
  0xe2   :  { %v270_v5 = vadd.f32 %v737_v3, %v95_v50  ;;  %v261_v6 = vpop.f32.mrb[5].mxu0 }
  0xe3   :  { %v262_v7 = vadd.f32 %v261_v6, %v85_v48  ;;  %v738_v8 = vpop.f32.mrb[6].mxu0  ;;  %747 = vmatprep.subr.bf16.mxu1 %v324_v4 }
  0xe4   :  { %v273_v9 = vadd.f32 %v738_v8, %v100_v54  ;;  %v264_v10 = vpop.f32.mrb[7].mxu0  ;;  %748 = vmatpush3.bf16.msra.mxu1 %v324_v4  ;;  %v314_v13 = vmax.f32 %v270_v5, 0.0  ;;  %v817_v54 = vld [vmem:[%s1075_s3 + $0x18] sm:$0xff]   ;;  %v382_v63 = vpop.permute.xlu1 %381 }
  0xe5   :  { %v265_v12 = vadd.f32 %v264_v10, %v90_v49  ;;  %749 = vmatprep.subr.bf16.mxu1 %v325_v1  ;;  %v312_v16 = vmax.f32 %v262_v7, 0.0 }
  0xe6   :  { %v315_v14 = vmax.f32 %v273_v9, 0.0 }
  0xe7   :  { %v313_v17 = vmax.f32 %v265_v12, 0.0 }
  0xe8   :  { %v327_v18 = vpack.c.bf16 %v315_v14, %v314_v13  ;;  %750 = vmatpush3.bf16.msra.mxu1 %v325_v1  ;;  %v392_v1 = vpop.permute.xlu1 %391 }
  0xe9   :  { %v326_v19 = vpack.c.bf16 %v313_v17, %v312_v16  ;;  %v741_v20 = vpop.f32.mrb[8].mxu0 }
  0xea   :  { %v286_v21 = vadd.f32 %v741_v20, %v115_v11  ;;  %v277_v22 = vpop.f32.mrb[9].mxu0 }
  0xeb   :  { %v278_v24 = vadd.f32 %v277_v22, %v105_v62  ;;  %v742_v25 = vpop.f32.mrb[10].mxu0  ;;  %751 = vmatprep.subr.bf16.mxu1 %v326_v19  ;;  %v377_v62 = vpop.permute.xlu0 %376 }
  0xec   :  { %v289_v26 = vadd.f32 %v742_v25, %v120_v15  ;;  %v280_v27 = vpop.f32.mrb[11].mxu0  ;;  %752 = vmatpush3.bf16.msra.mxu1 %v326_v19  ;;  %v318_v30 = vmax.f32 %v286_v21, 0.0  ;;  %v402_v6 = vpop.permute.xlu1 %401 }
  0xed   :  { %v281_v29 = vadd.f32 %v280_v27, %v110_v2  ;;  %753 = vmatprep.subr.bf16.mxu1 %v327_v18  ;;  %v316_v32 = vmax.f32 %v278_v24, 0.0 }
  0xee   :  { %v319_v31 = vmax.f32 %v289_v26, 0.0 }
  0xef   :  { %v317_v33 = vmax.f32 %v281_v29, 0.0  ;;  %v387_v0 = vpop.permute.xlu0 %386 }
  0xf0   :  { %v329_v34 = vpack.c.bf16 %v319_v31, %v318_v30  ;;  %754 = vmatpush3.bf16.msra.mxu1 %v327_v18  ;;  %v412_v18 = vpop.permute.xlu1 %411 }
  0xf1   :  { %v328_v36 = vpack.c.bf16 %v317_v33, %v316_v32  ;;  %v745_v37 = vpop.f32.mrb[12].mxu0 }
  0xf2   :  { %v302_v38 = vadd.f32 %v745_v37, %v135_v35  ;;  %v293_v39 = vpop.f32.mrb[13].mxu0 }
  0xf3   :  { %v294_v41 = vadd.f32 %v293_v39, %v125_v23  ;;  %v746_v42 = vpop.f32.mrb[14].mxu0  ;;  %755 = vmatprep.subr.bf16.mxu1 %v328_v36  ;;  %v397_v2 = vpop.permute.xlu0 %396 }
  0xf4   :  { %v305_v43 = vadd.f32 %v746_v42, %v140_v40  ;;  %v296_v44 = vpop.f32.mrb[15].mxu0  ;;  %756 = vmatpush3.bf16.msra.mxu1 %v328_v36  ;;  %v322_v46 = vmax.f32 %v302_v38, 0.0  ;;  %v422_v31 = vpop.permute.xlu1 %421 }
  0xf5   :  { %v297_v45 = vadd.f32 %v296_v44, %v130_v28  ;;  %757 = vmatprep.subr.bf16.mxu1 %v329_v34  ;;  %v320_v48 = vmax.f32 %v294_v41, 0.0 }
  0xf6   :  { %v323_v47 = vmax.f32 %v305_v43, 0.0 }
  0xf7   :  { %v321_v49 = vmax.f32 %v297_v45, 0.0  ;;  %v407_v14 = vpop.permute.xlu0 %406 }
  0xf8   :  { %v331_v50 = vpack.c.bf16 %v323_v47, %v322_v46  ;;  %758 = vmatpush3.bf16.msra.mxu1 %v329_v34  ;;  %v432_v44 = vpop.permute.xlu1 %431 }
  0xf9   :  { %v330_v51 = vpack.c.bf16 %v321_v49, %v320_v48 }
  0xfb   :  { %759 = vmatprep.subr.bf16.mxu1 %v330_v51  ;;  %v417_v27 = vpop.permute.xlu0 %416 }
  0xfc   :  { %760 = vmatpush3.bf16.msra.mxu1 %v330_v51 }
  0xfd   :  { %761 = vmatprep.subr.bf16.mxu1 %v331_v50 }
  0xff   :  { %v427_v39 = vpop.permute.xlu0 %426 }
 0x100   :  { %762 = vmatpush3.bf16.msra.mxu1 %v331_v50 }
 0x103   :  { %764 = vmatmul.mubr.bf16.vlgmr.msra.gmra.mrb[0].mxu1 %v815_v52  ;;  %v437_v51 = vpop.permute.xlu0 %436 }
 0x104   :  { %767 = vmatprep.mubr.bf16.mxu1 %v816_v53 }
 0x10b   :  { %768 = vmatmul.mubr.bf16.gmra.mrb[4].mxu1 %v817_v54 }
 0x10c   :  { %771 = vmatprep.mubr.bf16.mxu1 %v818_v55 }
 0x113   :  { %772 = vmatmul.mubr.bf16.gmra.mrb[8].mxu1 %v819_v56  ;;  %v442_v56 = vpop.permute.xlu1 %441 }
 0x114   :  { %775 = vmatprep.mubr.bf16.mxu1 %v820_v57 }
 0x11b   :  { %776 = vmatmul.mubr.bf16.gmra.mrb[12].mxu1 %v821_v58 }
 0x1d6   :  { %v765_v3 = vpop.f32.mrb[0].mxu1 }
 0x1d7   :  { %v535_v4 = vadd.f32 %v765_v3, %v377_v62  ;;  %v526_v5 = vpop.f32.mrb[1].mxu1 }
 0x1d8   :  { %v527_v7 = vadd.f32 %v526_v5, %v367_v60  ;;  %v766_v8 = vpop.f32.mrb[2].mxu1  ;;  %v613_v5 = vld [vmem:[%s1077_s5] sm:$0x1] }
 0x1d9   :  { %v538_v9 = vadd.f32 %v766_v8, %v382_v63  ;;  %v529_v10 = vpop.f32.mrb[3].mxu1  ;;  %v591_v12 = vmax.f32 %v535_v4, 0.0 }
 0x1da   :  { %v530_v11 = vadd.f32 %v529_v10, %v372_v61  ;;  %v589_v15 = vmax.f32 %v527_v7, 0.0 }
 0x1db   :  { %v592_v13 = vmax.f32 %v538_v9, 0.0 }
 0x1dc   :  { %v590_v16 = vmax.f32 %v530_v11, 0.0 }
 0x1dd   :  { %v606_v17 = vpack.c.bf16 %v592_v13, %v591_v12 }
 0x1de   :  { %v605_v19 = vpack.c.bf16 %v590_v16, %v589_v15  ;;  %v769_v20 = vpop.f32.mrb[4].mxu1 }
 0x1df   :  { %v551_v21 = vadd.f32 %v769_v20, %v397_v2  ;;  %v542_v22 = vpop.f32.mrb[5].mxu1 }
 0x1e0   :  { %v543_v23 = vadd.f32 %v542_v22, %v387_v0  ;;  %v770_v24 = vpop.f32.mrb[6].mxu1  ;;  %780 = vmatpush3.bf16.msra.mxu0 %v605_v19 }
 0x1e1   :  { %v554_v25 = vadd.f32 %v770_v24, %v402_v6  ;;  %v545_v26 = vpop.f32.mrb[7].mxu1  ;;  %781 = vmatprep.subr.bf16.mxu0 %v847_v59  ;;  %v595_v29 = vmax.f32 %v551_v21, 0.0  ;;  %v615_v6 = vstv %s1078_s6 }
 0x1e2   :  { %v546_v28 = vadd.f32 %v545_v26, %v392_v1  ;;  %v593_v32 = vmax.f32 %v543_v23, 0.0 }
 0x1e3   :  { %v596_v30 = vmax.f32 %v554_v25, 0.0 }
 0x1e4   :  { %v594_v33 = vmax.f32 %v546_v28, 0.0  ;;  %782 = vmatpush3.bf16.msra.mxu0 %v606_v17 }
 0x1e5   :  { %v608_v34 = vpack.c.bf16 %v596_v30, %v595_v29  ;;  %783 = vmatprep.subr.bf16.mxu0 %v847_v59 }
 0x1e6   :  { %v607_v35 = vpack.c.bf16 %v594_v33, %v593_v32  ;;  %v773_v36 = vpop.f32.mrb[8].mxu1 }
 0x1e7   :  { %v567_v37 = vadd.f32 %v773_v36, %v417_v27  ;;  %v558_v38 = vpop.f32.mrb[9].mxu1 }
 0x1e8   :  { %v559_v40 = vadd.f32 %v558_v38, %v407_v14  ;;  %v774_v41 = vpop.f32.mrb[10].mxu1  ;;  %784 = vmatpush3.bf16.msra.mxu0 %v607_v35 }
 0x1e9   :  { %v570_v42 = vadd.f32 %v774_v41, %v422_v31  ;;  %v561_v43 = vpop.f32.mrb[11].mxu1  ;;  %785 = vmatprep.subr.bf16.mxu0 %v847_v59  ;;  %v599_v46 = vmax.f32 %v567_v37, 0.0 }
 0x1ea   :  { %v562_v45 = vadd.f32 %v561_v43, %v412_v18  ;;  %v597_v48 = vmax.f32 %v559_v40, 0.0 }
 0x1eb   :  { %v600_v47 = vmax.f32 %v570_v42, 0.0 }
 0x1ec   :  { %v598_v49 = vmax.f32 %v562_v45, 0.0  ;;  %786 = vmatpush3.bf16.msra.mxu0 %v608_v34 }
 0x1ed   :  { %v610_v50 = vpack.c.bf16 %v600_v47, %v599_v46  ;;  %787 = vmatprep.subr.bf16.mxu0 %v847_v59 }
 0x1ee   :  { %v609_v52 = vpack.c.bf16 %v598_v49, %v597_v48  ;;  %v777_v53 = vpop.f32.mrb[12].mxu1 }
 0x1ef   :  { %v583_v54 = vadd.f32 %v777_v53, %v437_v51  ;;  %v574_v55 = vpop.f32.mrb[13].mxu1 }
 0x1f0   :  { %v575_v57 = vadd.f32 %v574_v55, %v427_v39  ;;  %v778_v58 = vpop.f32.mrb[14].mxu1  ;;  %788 = vmatpush3.bf16.msra.mxu0 %v609_v52 }
 0x1f1   :  { %v586_v60 = vadd.f32 %v778_v58, %v442_v56  ;;  %v577_v61 = vpop.f32.mrb[15].mxu1  ;;  %789 = vmatprep.subr.bf16.mxu0 %v847_v59  ;;  %v603_v63 = vmax.f32 %v583_v54, 0.0 }
 0x1f2   :  { %v578_v62 = vadd.f32 %v577_v61, %v432_v44  ;;  %v601_v1 = vmax.f32 %v575_v57, 0.0 }
 0x1f3   :  { %v604_v0 = vmax.f32 %v586_v60, 0.0 }
 0x1f4   :  { %v602_v2 = vmax.f32 %v578_v62, 0.0  ;;  %790 = vmatpush3.bf16.msra.mxu0 %v610_v50 }
 0x1f5   :  { %v612_v3 = vpack.c.bf16 %v604_v0, %v603_v63  ;;  %791 = vmatprep.subr.bf16.mxu0 %v847_v59 }
 0x1f6   :  { %v611_v4 = vpack.c.bf16 %v602_v2, %v601_v1 }
 0x1f8   :  { %792 = vmatpush3.bf16.msra.mxu0 %v611_v4 }
 0x1f9   :  { %793 = vmatprep.subr.bf16.mxu0 %v847_v59 }
 0x1fc   :  { %794 = vmatpush3.bf16.msra.mxu0 %v612_v3 }
 0x1ff   :  { %796 = vmatmul.mubr.bf16.vlgmr.msra.gmra.mrb[16].mxu0 %v613_v5 }
 0x2d2   :  { %v650_v7 = vpop.f32.mrb[16].mxu0 }
 0x2d3   :  { %v651_v8 = vadd.f32 %v650_v7, %v615_v6  ;;  %v797_v9 = vpop.f32.mrb[17].mxu0 }
 0x2d4   :  { %v653_v10 = vpop.f32.mrb[18].mxu0 }
 0x2d5   :  { %656 = vst [vmem:[#allocation3] sm:$0x1] %v651_v8  ;;  %v798_v11 = vpop.f32.mrb[19].mxu0 }
 0x2d6   :  { %833 = shalt.err (!%p830_p4)
}
 0x2d7   :  { %s834_s6 = scalar_lea.hbm %s1079_s7, 16 }
 0x2d8   :  { %p835_p5 = scmp.ne.s32.totalorder %s1079_s7, %s834_s6  ;;  %p838_p6 = scmp.lt.u32.totalorder %s834_s6, %s1079_s7 }
 0x2da   :  { %p840_p7 = pnand %p838_p6, %p835_p5 }
 0x2dc   :  { %843 = shalt.err (!%p840_p7)
}
 0x2dd   :  { %666 = dma.vmem_to_hbm [thread:$0]  %s664_s24, 16, %s1079_s7, [#allocation4]  }
 0x2de   :  { %844 = dma.done.wait [#allocation4], 16  }
 0x2df   :  { %845 = vsyncadd [#allocation4], 4294967280 }
 0x2e0   :  { %670 = vsyncpa [#allocation4], 1 }

</bundles_post_ra>
